<compile_context>
chip_gen: v6e
topology: v6e:2x2x1
jax: 0.10.0
libtpu: 0.0.40
codegen_flags: <defaults>
</compile_context>

<pallas_src>
import jax
import jax.numpy as jnp
from jax.experimental import pallas as pl
from jax.experimental.pallas import tpu as pltpu


LANE = 128


def _round_up(n: int, m: int) -> int:
    return ((n + m - 1) // m) * m


def mlp_kernel(x_ref,
               w1_ref, b1_ref,
               w2_ref, b2_ref,
               w3_ref, b3_ref,
               w4_ref, b4_ref,
               out_ref):
    bf16 = jnp.bfloat16

    # layer1 + ReLU  (bf16 matmul, f32 accumulate + epilogue)
    x = x_ref[...].astype(bf16)
    h1 = jnp.dot(x, w1_ref[...], preferred_element_type=jnp.float32) + b1_ref[...]
    h1 = jnp.maximum(h1, 0.0)

    # layer2 + ReLU
    h2 = jnp.dot(h1.astype(bf16), w2_ref[...],
                 preferred_element_type=jnp.float32) + b2_ref[...]
    h2 = jnp.maximum(h2, 0.0)

    # layer3 + ReLU (output lane-padded to 128; padded lanes are exactly 0)
    h3 = jnp.dot(h2.astype(bf16), w3_ref[...],
                 preferred_element_type=jnp.float32) + b3_ref[...]
    h3 = jnp.maximum(h3, 0.0)

    # layer4 (no activation; lane-dense 128-wide store, real logits in lanes 0..3)
    y = jnp.dot(h3.astype(bf16), w4_ref[...],
                preferred_element_type=jnp.float32) + b4_ref[...]
    out_ref[...] = y.astype(out_ref.dtype)


def net_forward(x, params, *, tile_b: int = 256):
    """x: [B, dims*dims] float32; params: dict from init_params. Returns [B, 4] f32."""
    B, d_in = x.shape
    w1, b1 = params["w1"], params["b1"]
    w2, b2 = params["w2"], params["b2"]
    w3, b3 = params["w3"], params["b3"]
    w4, b4 = params["w4"], params["b4"]
    out_pad = w4.shape[1]

    # Batch tile: at most `tile_b`, at least the (sublane-aligned) batch itself.
    TB = min(tile_b, _round_up(B, 8))
    B_pad = _round_up(B, TB)
    if B_pad != B:
        x = jnp.pad(x, ((0, B_pad - B), (0, 0)))
    nb = B_pad // TB

    # Weights/biases: constant index_map -> DMA'd once, VMEM-resident across tiles.
    const2d = lambda i: (0, 0)

    out = pl.pallas_call(
        mlp_kernel,
        out_shape=jax.ShapeDtypeStruct((B_pad, out_pad), jnp.float32),
        grid=(nb,),
        in_specs=[
            pl.BlockSpec((TB, d_in), lambda i: (i, 0)),       # x: batch-tiled
            pl.BlockSpec(w1.shape, const2d),
            pl.BlockSpec(b1.shape, const2d),
            pl.BlockSpec(w2.shape, const2d),
            pl.BlockSpec(b2.shape, const2d),
            pl.BlockSpec(w3.shape, const2d),
            pl.BlockSpec(b3.shape, const2d),
            pl.BlockSpec(w4.shape, const2d),
            pl.BlockSpec(b4.shape, const2d),
        ],
        out_specs=pl.BlockSpec((TB, out_pad), lambda i: (i, 0)),
        compiler_params=pltpu.CompilerParams(
            dimension_semantics=("parallel",)),
    )(x, w1, b1, w2, b2, w3, b3, w4, b4)

    return out[:B, :4]


def init_params(dims: int, key):
    """PyTorch-Linear-style init (U[-1/sqrt(fan_in), +1/sqrt(fan_in)]).

    Weights stored pre-transposed as [in, out] in bfloat16; biases as (1, out)
    float32.  Layers 3/4 are zero-padded out to 128 lanes so all matmuls and the
    final store are lane-dense.
    """
    d2 = dims * dims
    d3 = dims                        # real layer-3 width
    d3_pad = _round_up(d3, LANE)     # lane-padded layer-3 width
    d4 = 4                           # real output width
    d4_pad = _round_up(d4, LANE)     # lane-padded output width

    layer_dims = [(d2, 2 * d2), (2 * d2, d2), (d2, d3), (d3, d4)]
    keys = jax.random.split(key, 2 * len(layer_dims))

    raw = []
    for i, (fan_in, fan_out) in enumerate(layer_dims):
        bound = 1.0 / (fan_in ** 0.5)
        w = jax.random.uniform(keys[2 * i], (fan_in, fan_out),
                               minval=-bound, maxval=bound, dtype=jnp.float32)
        b = jax.random.uniform(keys[2 * i + 1], (1, fan_out),
                               minval=-bound, maxval=bound, dtype=jnp.float32)
        raw.append((w, b))

    (w1, b1), (w2, b2), (w3, b3), (w4, b4) = raw

    # Pad layer 3 output and layer 4 input/output to 128 lanes with zeros.
    # Padded h3 lanes are exactly 0 (zero weight column + zero bias -> relu(0)=0),
    # and padded w4 rows/cols are zero, so logits in lanes 0..3 are unchanged.
    w3 = jnp.pad(w3, ((0, 0), (0, d3_pad - d3)))
    b3 = jnp.pad(b3, ((0, 0), (0, d3_pad - d3)))
    w4 = jnp.pad(w4, ((0, d3_pad - d3), (0, d4_pad - d4)))
    b4 = jnp.pad(b4, ((0, 0), (0, d4_pad - d4)))

    bf16 = jnp.bfloat16
    return {
        "w1": w1.astype(bf16), "b1": b1,
        "w2": w2.astype(bf16), "b2": b2,
        "w3": w3.astype(bf16), "b3": b3,
        "w4": w4.astype(bf16), "b4": b4,
    }


def reference_forward(x, p):
    """Pure-JAX reference mirroring the kernel math (bf16 operands, f32 accum)."""
    bf16 = jnp.bfloat16
    h1 = jnp.maximum(
        jnp.dot(x.astype(bf16), p["w1"], preferred_element_type=jnp.float32) + p["b1"], 0.0)
    h2 = jnp.maximum(
        jnp.dot(h1.astype(bf16), p["w2"], preferred_element_type=jnp.float32) + p["b2"], 0.0)
    h3 = jnp.maximum(
        jnp.dot(h2.astype(bf16), p["w3"], preferred_element_type=jnp.float32) + p["b3"], 0.0)
    y = jnp.dot(h3.astype(bf16), p["w4"], preferred_element_type=jnp.float32) + p["b4"]
    return y[:, :4]


if __name__ == "__main__":
    dims = 16          # board is dims x dims -> input feature dim = 256
    batch = 8

    key = jax.random.PRNGKey(0)
    pkey, xkey = jax.random.split(key)
    params = init_params(dims, pkey)
    x = jax.random.normal(xkey, (batch, dims * dims), dtype=jnp.float32)

    y = net_forward(x, params)
    y = jax.block_until_ready(y)

    # sanity check against a pure-JAX reference using the same bf16 weights
    y_ref = jax.block_until_ready(reference_forward(x, params))
    assert y.shape == (batch, 4)
    assert jnp.allclose(y, y_ref, atol=1e-3, rtol=1e-3)

    print("KERNEL_OK")
</pallas_src>

<mosaic_0001>
module attributes {stable_mosaic.version = 11 : i64} {
  func.func @mlp_kernel(%arg0: i32, %arg1: memref<8x256xf32, #tpu.memory_space<vmem>>, %arg2: memref<256x512xbf16, #tpu.memory_space<vmem>>, %arg3: memref<1x512xf32, #tpu.memory_space<vmem>>, %arg4: memref<512x256xbf16, #tpu.memory_space<vmem>>, %arg5: memref<1x256xf32, #tpu.memory_space<vmem>>, %arg6: memref<256x128xbf16, #tpu.memory_space<vmem>>, %arg7: memref<1x128xf32, #tpu.memory_space<vmem>>, %arg8: memref<128x128xbf16, #tpu.memory_space<vmem>>, %arg9: memref<1x128xf32, #tpu.memory_space<vmem>>, %arg10: memref<8x128xf32, #tpu.memory_space<vmem>>) attributes {dimension_semantics = [#tpu.dimension_semantics<parallel>], iteration_bounds = array<i64: 1>, scalar_prefetch = 0 : i64, scratch_operands = 0 : i64, tpu.core_type = #tpu.core_type<tc>, window_params = [{transform_indices = @transform_0, window_bounds = array<i64: 8, 256>}, {pipeline_mode = #tpu.pipeline_mode<synchronous>, transform_indices = @transform_1, window_bounds = array<i64: 256, 512>}, {pipeline_mode = #tpu.pipeline_mode<synchronous>, transform_indices = @transform_2, window_bounds = array<i64: 1, 512>}, {pipeline_mode = #tpu.pipeline_mode<synchronous>, transform_indices = @transform_3, window_bounds = array<i64: 512, 256>}, {pipeline_mode = #tpu.pipeline_mode<synchronous>, transform_indices = @transform_4, window_bounds = array<i64: 1, 256>}, {pipeline_mode = #tpu.pipeline_mode<synchronous>, transform_indices = @transform_5, window_bounds = array<i64: 256, 128>}, {pipeline_mode = #tpu.pipeline_mode<synchronous>, transform_indices = @transform_6, window_bounds = array<i64: 1, 128>}, {pipeline_mode = #tpu.pipeline_mode<synchronous>, transform_indices = @transform_7, window_bounds = array<i64: 128, 128>}, {pipeline_mode = #tpu.pipeline_mode<synchronous>, transform_indices = @transform_8, window_bounds = array<i64: 1, 128>}, {transform_indices = @transform_9, window_bounds = array<i64: 8, 128>}]} {
    %c0 = arith.constant 0 : index
    %c0_0 = arith.constant 0 : index
    %0 = vector.load %arg1[%c0, %c0_0] : memref<8x256xf32, #tpu.memory_space<vmem>>, vector<8x256xf32>
    %1 = arith.truncf %0 : vector<8x256xf32> to vector<8x256xbf16>
    %c0_1 = arith.constant 0 : index
    %c0_2 = arith.constant 0 : index
    %2 = vector.load %arg2[%c0_1, %c0_2] : memref<256x512xbf16, #tpu.memory_space<vmem>>, vector<256x512xbf16>
    %cst = arith.constant dense<0.000000e+00> : vector<8x512xf32>
    %3 = tpu.matmul %1, %2, %cst {dimension_numbers = #tpu.dot_dimension_numbers<[1], [0], [0], [1], [0, 0, 1, 1], [], []>} : vector<8x256xbf16>, vector<256x512xbf16>, vector<8x512xf32> -> vector<8x512xf32>
    %c0_3 = arith.constant 0 : index
    %c0_4 = arith.constant 0 : index
    %4 = vector.load %arg3[%c0_3, %c0_4] : memref<1x512xf32, #tpu.memory_space<vmem>>, vector<1x512xf32>
    %5 = vector.broadcast %4 : vector<1x512xf32> to vector<8x512xf32>
    %6 = arith.addf %3, %5 : vector<8x512xf32>
    %cst_5 = arith.constant 0.000000e+00 : f32
    %7 = vector.broadcast %cst_5 : f32 to vector<8x512xf32>
    %8 = arith.maximumf %6, %7 : vector<8x512xf32>
    %9 = arith.truncf %8 : vector<8x512xf32> to vector<8x512xbf16>
    %c0_6 = arith.constant 0 : index
    %c0_7 = arith.constant 0 : index
    %10 = vector.load %arg4[%c0_6, %c0_7] : memref<512x256xbf16, #tpu.memory_space<vmem>>, vector<512x256xbf16>
    %cst_8 = arith.constant dense<0.000000e+00> : vector<8x256xf32>
    %11 = tpu.matmul %9, %10, %cst_8 {dimension_numbers = #tpu.dot_dimension_numbers<[1], [0], [0], [1], [0, 0, 1, 1], [], []>} : vector<8x512xbf16>, vector<512x256xbf16>, vector<8x256xf32> -> vector<8x256xf32>
    %c0_9 = arith.constant 0 : index
    %c0_10 = arith.constant 0 : index
    %12 = vector.load %arg5[%c0_9, %c0_10] : memref<1x256xf32, #tpu.memory_space<vmem>>, vector<1x256xf32>
    %13 = vector.broadcast %12 : vector<1x256xf32> to vector<8x256xf32>
    %14 = arith.addf %11, %13 : vector<8x256xf32>
    %cst_11 = arith.constant 0.000000e+00 : f32
    %15 = vector.broadcast %cst_11 : f32 to vector<8x256xf32>
    %16 = arith.maximumf %14, %15 : vector<8x256xf32>
    %17 = arith.truncf %16 : vector<8x256xf32> to vector<8x256xbf16>
    %c0_12 = arith.constant 0 : index
    %c0_13 = arith.constant 0 : index
    %18 = vector.load %arg6[%c0_12, %c0_13] : memref<256x128xbf16, #tpu.memory_space<vmem>>, vector<256x128xbf16>
    %cst_14 = arith.constant dense<0.000000e+00> : vector<8x128xf32>
    %19 = tpu.matmul %17, %18, %cst_14 {dimension_numbers = #tpu.dot_dimension_numbers<[1], [0], [0], [1], [0, 0, 1, 1], [], []>} : vector<8x256xbf16>, vector<256x128xbf16>, vector<8x128xf32> -> vector<8x128xf32>
    %c0_15 = arith.constant 0 : index
    %c0_16 = arith.constant 0 : index
    %20 = vector.load %arg7[%c0_15, %c0_16] : memref<1x128xf32, #tpu.memory_space<vmem>>, vector<1x128xf32>
    %21 = vector.broadcast %20 : vector<1x128xf32> to vector<8x128xf32>
    %22 = arith.addf %19, %21 : vector<8x128xf32>
    %cst_17 = arith.constant 0.000000e+00 : f32
    %23 = vector.broadcast %cst_17 : f32 to vector<8x128xf32>
    %24 = arith.maximumf %22, %23 : vector<8x128xf32>
    %25 = arith.truncf %24 : vector<8x128xf32> to vector<8x128xbf16>
    %c0_18 = arith.constant 0 : index
    %c0_19 = arith.constant 0 : index
    %26 = vector.load %arg8[%c0_18, %c0_19] : memref<128x128xbf16, #tpu.memory_space<vmem>>, vector<128x128xbf16>
    %cst_20 = arith.constant dense<0.000000e+00> : vector<8x128xf32>
    %27 = tpu.matmul %25, %26, %cst_20 {dimension_numbers = #tpu.dot_dimension_numbers<[1], [0], [0], [1], [0, 0, 1, 1], [], []>} : vector<8x128xbf16>, vector<128x128xbf16>, vector<8x128xf32> -> vector<8x128xf32>
    %c0_21 = arith.constant 0 : index
    %c0_22 = arith.constant 0 : index
    %28 = vector.load %arg9[%c0_21, %c0_22] : memref<1x128xf32, #tpu.memory_space<vmem>>, vector<1x128xf32>
    %29 = vector.broadcast %28 : vector<1x128xf32> to vector<8x128xf32>
    %30 = arith.addf %27, %29 : vector<8x128xf32>
    %c0_23 = arith.constant 0 : index
    %c0_24 = arith.constant 0 : index
    %31 = vector.load %arg10[%c0_23, %c0_24] : memref<8x128xf32, #tpu.memory_space<vmem>>, vector<8x128xf32>
    tpu.vector_store %arg10[%c0_23, %c0_24], %30 {strides = array<i32>} : memref<8x128xf32, #tpu.memory_space<vmem>>, vector<8x128xf32>,
    return
  }
  func.func @transform_0(%arg0: i32) -> (i32, i32) {
    %c0_i32 = arith.constant 0 : i32
    %c0_i32_0 = arith.constant 0 : i32
    return %arg0, %c0_i32 : i32, i32
  }
  func.func @transform_1(%arg0: i32) -> (i32, i32) {
    %c0_i32 = arith.constant 0 : i32
    %c0_i32_0 = arith.constant 0 : i32
    %c0_i32_1 = arith.constant 0 : i32
    return %c0_i32, %c0_i32_0 : i32, i32
  }
  func.func @transform_2(%arg0: i32) -> (i32, i32) {
    %c0_i32 = arith.constant 0 : i32
    %c0_i32_0 = arith.constant 0 : i32
    %c0_i32_1 = arith.constant 0 : i32
    return %c0_i32, %c0_i32_0 : i32, i32
  }
  func.func @transform_3(%arg0: i32) -> (i32, i32) {
    %c0_i32 = arith.constant 0 : i32
    %c0_i32_0 = arith.constant 0 : i32
    %c0_i32_1 = arith.constant 0 : i32
    return %c0_i32, %c0_i32_0 : i32, i32
  }
  func.func @transform_4(%arg0: i32) -> (i32, i32) {
    %c0_i32 = arith.constant 0 : i32
    %c0_i32_0 = arith.constant 0 : i32
    %c0_i32_1 = arith.constant 0 : i32
    return %c0_i32, %c0_i32_0 : i32, i32
  }
  func.func @transform_5(%arg0: i32) -> (i32, i32) {
    %c0_i32 = arith.constant 0 : i32
    %c0_i32_0 = arith.constant 0 : i32
    %c0_i32_1 = arith.constant 0 : i32
    return %c0_i32, %c0_i32_0 : i32, i32
  }
  func.func @transform_6(%arg0: i32) -> (i32, i32) {
    %c0_i32 = arith.constant 0 : i32
    %c0_i32_0 = arith.constant 0 : i32
    %c0_i32_1 = arith.constant 0 : i32
    return %c0_i32, %c0_i32_0 : i32, i32
  }
  func.func @transform_7(%arg0: i32) -> (i32, i32) {
    %c0_i32 = arith.constant 0 : i32
    %c0_i32_0 = arith.constant 0 : i32
    %c0_i32_1 = arith.constant 0 : i32
    return %c0_i32, %c0_i32_0 : i32, i32
  }
  func.func @transform_8(%arg0: i32) -> (i32, i32) {
    %c0_i32 = arith.constant 0 : i32
    %c0_i32_0 = arith.constant 0 : i32
    %c0_i32_1 = arith.constant 0 : i32
    return %c0_i32, %c0_i32_0 : i32, i32
  }
  func.func @transform_9(%arg0: i32) -> (i32, i32) {
    %c0_i32 = arith.constant 0 : i32
    %c0_i32_0 = arith.constant 0 : i32
    return %arg0, %c0_i32 : i32, i32
  }
}

</mosaic_0001>

<bundles_post_ra>
// kernel: tpu_custom_call.1
= control target key start
LH: loop header
LB: loop body
LE: loop exit
PB: predicated region body
PF: predicated region fallthrough
CT: control target
= control target key end

     0   :  { %14 = vsyncpa [#allocation3], 0  ;;  %s2096_s0 = inlined_call_operand.hbm [shape: f32[8,256], index: 0, kind: input, shape index: {}]   ;;  %s2097_s1 = inlined_call_operand.hbm [shape: bf16[256,512], index: 1, kind: input, shape index: {}]   ;;  %s2098_s2 = inlined_call_operand.hbm [shape: f32[1,512], index: 2, kind: input, shape index: {}]   ;;  %s2099_s3 = inlined_call_operand.hbm [shape: bf16[512,256], index: 3, kind: input, shape index: {}]   ;;  %s2100_s4 = inlined_call_operand.vmem [shape: f32[1,256], index: 4, kind: input, shape index: {}]   ;;  %s2101_s5 = inlined_call_operand.hbm [shape: bf16[256,128], index: 5, kind: input, shape index: {}]   ;;  %s2102_s6 = inlined_call_operand.vmem [shape: f32[1,128], index: 6, kind: input, shape index: {}]   ;;  %s2103_s7 = inlined_call_operand.hbm [shape: bf16[128,128], index: 7, kind: input, shape index: {}]   ;;  %s2104_s8 = inlined_call_operand.vmem [shape: f32[1,128], index: 8, kind: input, shape index: {}]   ;;  %s2105_s9 = inlined_call_operand.hbm [shape: f32[8,128], index: 9, kind: output, shape index: {}]  }
   0x1   :  { %15 = vsyncpa [#allocation6], 0 }
   0x2   :  { %16 = vsyncpa [#allocation9], 0 }
   0x3   :  { %17 = vsyncpa [#allocation12], 0 }
   0x4   :  { %18 = vsyncpa [#allocation4], 0  ;;  %s1987_s30 = smov [#allocation5]  }
   0x5   :  { %s34_s10 = sshll.u32 %s1987_s30, 4  ;;  %s35_s10 = int_to_ptr.vmem [resolvable:$true] %s34_s10 }
   0x6   :  { %s1845_s11 = scalar_lea.vmem %s35_s10, 8192  ;;  %p1850_p1 = scmp.lt.s32.totalorder %s35_s10, %s35_s10 }
   0x7   :  { %p1846_p0 = scmp.ne.s32.totalorder %s35_s10, %s1845_s11  ;;  %p1851_p2 = scmp.lt.s32.totalorder %s1845_s11, %s1845_s11 }
   0x9   :  { %p1852_p3 = por %p1851_p2, %p1850_p1 }
   0xb   :  { %p1853_p4 = pnand %p1852_p3, %p1846_p0 }
   0xd   :  { %1856 = shalt.err (!%p1853_p4)
}
   0xe   :  { %s1988_s12 = smov 256   ;;  %s1989_s13 = smov 16  }
   0xf   :  { %40 = dma.hbm_to_vmem [thread:$0]  %s2097_s1, 8192, %s35_s10, [#allocation6], %s1988_s12, %s1988_s12, %s1989_s13  }
  0x10   :  { %s1990_s16 = smov [#allocation8]  }
  0x11   :  { %s56_s17 = sshll.u32 %s1990_s16, 4  ;;  %s57_s17 = int_to_ptr.vmem [resolvable:$true] %s56_s17 }
  0x12   :  { %s1865_s18 = scalar_lea.vmem %s57_s17, 8192  ;;  %p1870_p6 = scmp.lt.s32.totalorder %s57_s17, %s57_s17 }
  0x13   :  { %p1866_p5 = scmp.ne.s32.totalorder %s57_s17, %s1865_s18  ;;  %p1871_p7 = scmp.lt.s32.totalorder %s1865_s18, %s1865_s18 }
  0x15   :  { %p1872_p8 = por %p1871_p7, %p1870_p6 }
  0x17   :  { %p1873_p9 = pnand %p1872_p8, %p1866_p5 }
  0x19   :  { %1876 = shalt.err (!%p1873_p9)
}
  0x1a   :  { %s1991_s19 = smov 128   ;;  %s1992_s20 = smov 8  }
  0x1b   :  { %62 = dma.hbm_to_vmem [thread:$0]  %s2099_s3, 8192, %s57_s17, [#allocation9], %s1991_s19, %s1991_s19, %s1992_s20  }
  0x1c   :  { %s1993_s23 = smov [#allocation2]   ;;  %s1994_s25 = smov [#allocation7]  }
  0x1d   :  { %s25_s24 = sshll.u32 %s1993_s23, 4  ;;  %s47_s1 = sshll.u32 %s1994_s25, 4  ;;  %s26_s24 = int_to_ptr.vmem [resolvable:$true] %s25_s24  ;;  %s48_s1 = int_to_ptr.vmem [resolvable:$true] %s47_s1 }
  0x1e   :  { %s1885_s26 = scalar_lea.vmem %s26_s24, 256  ;;  %p1890_p11 = scmp.lt.s32.totalorder %s26_s24, %s26_s24 }
  0x1f   :  { %p1886_p10 = scmp.ne.s32.totalorder %s26_s24, %s1885_s26  ;;  %p1891_p12 = scmp.lt.s32.totalorder %s1885_s26, %s1885_s26 }
  0x21   :  { %p1892_p13 = por %p1891_p12, %p1890_p11 }
  0x23   :  { %p1893_p0 = pnand %p1892_p13, %p1886_p10 }
  0x25   :  { %1896 = shalt.err (!%p1893_p0)
}
  0x26   :  { %28 = dma.hbm_to_vmem [thread:$0]  %s2096_s0, 256, %s26_s24, [#allocation3]  }
  0x27   :  { %s1905_s29 = scalar_lea.vmem %s48_s1, 64  ;;  %p1910_p2 = scmp.lt.s32.totalorder %s48_s1, %s48_s1 }
  0x28   :  { %p1906_p1 = scmp.ne.s32.totalorder %s48_s1, %s1905_s29  ;;  %p1911_p3 = scmp.lt.s32.totalorder %s1905_s29, %s1905_s29 }
  0x2a   :  { %p1912_p4 = por %p1911_p3, %p1910_p2 }
  0x2c   :  { %p1913_p5 = pnand %p1912_p4, %p1906_p1 }
  0x2e   :  { %1916 = shalt.err (!%p1913_p5)
}
  0x2f   :  { %50 = dma.hbm_to_vmem [thread:$0]  %s2098_s2, 64, %s48_s1, [#allocation6]  }
  0x30   :  { %s1995_s10 = smov [#allocation10]  }
  0x31   :  { %s70_s11 = sshll.u32 %s1995_s10, 4  ;;  %s71_s11 = int_to_ptr.vmem [resolvable:$true] %s70_s11 }
  0x32   :  { %s1925_s12 = scalar_lea.vmem %s71_s11, 2048  ;;  %p1930_p7 = scmp.lt.s32.totalorder %s71_s11, %s71_s11 }
  0x33   :  { %p1926_p6 = scmp.ne.s32.totalorder %s71_s11, %s1925_s12  ;;  %p1931_p8 = scmp.lt.s32.totalorder %s1925_s12, %s1925_s12 }
  0x35   :  { %p1932_p9 = por %p1931_p8, %p1930_p7 }
  0x37   :  { %p1933_p10 = pnand %p1932_p9, %p1926_p6 }
  0x39   :  { %1936 = shalt.err (!%p1933_p10)
}
  0x3a   :  { %s1996_s0 = smov 64   ;;  %s1997_s13 = smov 4  }
  0x3b   :  { %76 = dma.hbm_to_vmem [thread:$0]  %s2101_s5, 2048, %s71_s11, [#allocation9], %s1996_s0, %s1996_s0, %s1997_s13  }
  0x3c   :  { %s1998_s16 = smov [#allocation11]  }
  0x3d   :  { %s84_s17 = sshll.u32 %s1998_s16, 4  ;;  %s85_s17 = int_to_ptr.vmem [resolvable:$true] %s84_s17 }
  0x3e   :  { %s1945_s2 = scalar_lea.vmem %s85_s17, 1024  ;;  %p1950_p12 = scmp.lt.s32.totalorder %s85_s17, %s85_s17 }
  0x3f   :  { %p1946_p11 = scmp.ne.s32.totalorder %s85_s17, %s1945_s2  ;;  %p1951_p13 = scmp.lt.s32.totalorder %s1945_s2, %s1945_s2 }
  0x41   :  { %p1952_p0 = por %p1951_p13, %p1950_p12 }
  0x43   :  { %p1953_p1 = pnand %p1952_p0, %p1946_p11 }
  0x45   :  { %1956 = shalt.err (!%p1953_p1)
}
  0x46   :  { %90 = dma.hbm_to_vmem [thread:$0]  %s2103_s7, 1024, %s85_s17, [#allocation12], %s1996_s0, %s1996_s0, %s1997_s13  }
  0x47   :  { %1977 = dma.done.wait [#allocation3], 256  }
  0x48   :  { %1978 = vsyncadd [#allocation3], 4294967040 }
  0x49   :  { %1979 = dma.done.wait [#allocation6], 8256  }
  0x4a   :  { %1980 = vsyncadd [#allocation6], 4294959040 }
  0x4b   :  { %1981 = dma.done.wait [#allocation9], 10240  }
  0x4c   :  { %1982 = vsyncadd [#allocation9], 4294957056 }
  0x4d   :  { %1983 = dma.done.wait [#allocation12], 1024  }
  0x4e   :  { %1984 = vsyncadd [#allocation12], 4294966272  ;;  %v1621_v0 = vld [vmem:[#allocation5 + $0xe4] ss:$16 sps:$4 sm:$0xff]   ;;  %v1623_v1 = vld [vmem:[#allocation5 + $0xec] ss:$16 sps:$4 sm:$0xff]  }
  0x4f   :  { %522 = vmatprep.subr.bf16.mxu0 %v1621_v0  ;;  %v1625_v2 = vld [vmem:[#allocation5 + $0xe0] ss:$16 sps:$4 sm:$0xff]   ;;  %v1626_v3 = vld [vmem:[#allocation5 + $0xe8] ss:$16 sps:$4 sm:$0xff]   ;;  %563 = vmatprep.subr.bf16.mxu1 %v1623_v1  ;;  %v1627_v4 = vld [vmem:[#allocation5 + $0xc4] ss:$16 sps:$4 sm:$0xff]  }
  0x50   :  { %523 = vmatpush1.bf16.msra.mxu0 %v1625_v2  ;;  %564 = vmatpush1.bf16.msra.mxu1 %v1626_v3  ;;  %v1629_v5 = vld [vmem:[#allocation5 + $0xcc] ss:$16 sps:$4 sm:$0xff]   ;;  %v1631_v6 = vld [vmem:[#allocation5 + $0xc0] ss:$16 sps:$4 sm:$0xff]   ;;  %v1632_v7 = vld [vmem:[#allocation5 + $0xc8] ss:$16 sps:$4 sm:$0xff]  }
  0x51   :  { %524 = vmatprep.subr.bf16.mxu0 %v1627_v4  ;;  %565 = vmatprep.subr.bf16.mxu1 %v1629_v5  ;;  %v1633_v8 = vld [vmem:[#allocation5 + $0xa4] ss:$16 sps:$4 sm:$0xff]   ;;  %v1635_v9 = vld [vmem:[#allocation5 + $0xac] ss:$16 sps:$4 sm:$0xff]   ;;  %v1637_v10 = vld [vmem:[#allocation5 + $0xa0] ss:$16 sps:$4 sm:$0xff]  }
  0x52   :  { %v1638_v11 = vld [vmem:[#allocation5 + $0xa8] ss:$16 sps:$4 sm:$0xff]   ;;  %v1639_v12 = vld [vmem:[#allocation5 + $0x84] ss:$16 sps:$4 sm:$0xff]   ;;  %v1641_v13 = vld [vmem:[#allocation5 + $0x8c] ss:$16 sps:$4 sm:$0xff]  }
  0x53   :  { %v1643_v14 = vld [vmem:[#allocation5 + $0x80] ss:$16 sps:$4 sm:$0xff]   ;;  %v1644_v15 = vld [vmem:[#allocation5 + $0x88] ss:$16 sps:$4 sm:$0xff]   ;;  %v1645_v16 = vld [vmem:[#allocation5 + $0x64] ss:$16 sps:$4 sm:$0xff]  }
  0x54   :  { %525 = vmatpush1.bf16.msra.mxu0 %v1631_v6  ;;  %566 = vmatpush1.bf16.msra.mxu1 %v1632_v7  ;;  %v1647_v17 = vld [vmem:[#allocation5 + $0x6c] ss:$16 sps:$4 sm:$0xff]   ;;  %v1649_v18 = vld [vmem:[#allocation5 + $0x60] ss:$16 sps:$4 sm:$0xff]   ;;  %v1650_v19 = vld [vmem:[#allocation5 + $0x68] ss:$16 sps:$4 sm:$0xff]  }
  0x55   :  { %526 = vmatprep.subr.bf16.mxu0 %v1633_v8  ;;  %567 = vmatprep.subr.bf16.mxu1 %v1635_v9  ;;  %v1651_v20 = vld [vmem:[#allocation5 + $0x44] ss:$16 sps:$4 sm:$0xff]   ;;  %v1653_v21 = vld [vmem:[#allocation5 + $0x4c] ss:$16 sps:$4 sm:$0xff]   ;;  %v1655_v22 = vld [vmem:[#allocation5 + $0x40] ss:$16 sps:$4 sm:$0xff]  }
  0x56   :  { %v1656_v23 = vld [vmem:[#allocation5 + $0x48] ss:$16 sps:$4 sm:$0xff]   ;;  %v1657_v24 = vld [vmem:[#allocation5 + $0x24] ss:$16 sps:$4 sm:$0xff]   ;;  %v1659_v25 = vld [vmem:[#allocation5 + $0x2c] ss:$16 sps:$4 sm:$0xff]  }
  0x57   :  { %v1661_v26 = vld [vmem:[#allocation5 + $0x20] ss:$16 sps:$4 sm:$0xff]   ;;  %v1662_v27 = vld [vmem:[#allocation5 + $0x28] ss:$16 sps:$4 sm:$0xff]   ;;  %v1663_v28 = vld [vmem:[#allocation5 + $0x4] ss:$16 sps:$4 sm:$0xff]  }
  0x58   :  { %527 = vmatpush1.bf16.msra.mxu0 %v1637_v10  ;;  %568 = vmatpush1.bf16.msra.mxu1 %v1638_v11  ;;  %v1665_v29 = vld [vmem:[#allocation5 + $0xc] ss:$16 sps:$4 sm:$0xff]   ;;  %v1667_v30 = vld [vmem:[#allocation5] ss:$16 sps:$4 sm:$0xff]   ;;  %v1668_v31 = vld [vmem:[#allocation5 + $0x8] ss:$16 sps:$4 sm:$0xff]  }
  0x59   :  { %528 = vmatprep.subr.bf16.mxu0 %v1639_v12  ;;  %569 = vmatprep.subr.bf16.mxu1 %v1641_v13  ;;  %v1669_v32 = vld [vmem:[#allocation5 + $0x1e4] ss:$16 sps:$4 sm:$0xff]   ;;  %v1671_v33 = vld [vmem:[#allocation5 + $0x1ec] ss:$16 sps:$4 sm:$0xff]   ;;  %v1673_v34 = vld [vmem:[#allocation5 + $0x1e0] ss:$16 sps:$4 sm:$0xff]  }
  0x5a   :  { %v1674_v35 = vld [vmem:[#allocation5 + $0x1e8] ss:$16 sps:$4 sm:$0xff]   ;;  %v1675_v36 = vld [vmem:[#allocation5 + $0x1c4] ss:$16 sps:$4 sm:$0xff]   ;;  %v1677_v37 = vld [vmem:[#allocation5 + $0x1cc] ss:$16 sps:$4 sm:$0xff]  }
  0x5b   :  { %v1679_v38 = vld [vmem:[#allocation5 + $0x1c0] ss:$16 sps:$4 sm:$0xff]   ;;  %v1680_v39 = vld [vmem:[#allocation5 + $0x1c8] ss:$16 sps:$4 sm:$0xff]   ;;  %v1681_v40 = vld [vmem:[#allocation5 + $0x1a4] ss:$16 sps:$4 sm:$0xff]  }
  0x5c   :  { %529 = vmatpush1.bf16.msra.mxu0 %v1643_v14  ;;  %570 = vmatpush1.bf16.msra.mxu1 %v1644_v15  ;;  %v1683_v41 = vld [vmem:[#allocation5 + $0x1ac] ss:$16 sps:$4 sm:$0xff]   ;;  %v1685_v42 = vld [vmem:[#allocation5 + $0x1a0] ss:$16 sps:$4 sm:$0xff]   ;;  %v1686_v43 = vld [vmem:[#allocation5 + $0x1a8] ss:$16 sps:$4 sm:$0xff]  }
  0x5d   :  { %530 = vmatprep.subr.bf16.mxu0 %v1645_v16  ;;  %571 = vmatprep.subr.bf16.mxu1 %v1647_v17  ;;  %v1687_v44 = vld [vmem:[#allocation5 + $0x184] ss:$16 sps:$4 sm:$0xff]   ;;  %v1689_v45 = vld [vmem:[#allocation5 + $0x18c] ss:$16 sps:$4 sm:$0xff]   ;;  %v1691_v48 = vld [vmem:[#allocation5 + $0x180] ss:$16 sps:$4 sm:$0xff]  }
  0x5e   :  { %v113_v46 = vld [vmem:[#allocation2 + $0x8] sm:$0xff]  ;;  %v1693_v50 = vld [vmem:[#allocation5 + $0x164] ss:$16 sps:$4 sm:$0xff]   ;;  %v1697_v52 = vld [vmem:[#allocation5 + $0x160] ss:$16 sps:$4 sm:$0xff]   ;;  %vm2000_vm0 = vmmov 0  }
  0x5f   :  { %v115_v47 = vpack.c.bf16 %v113_v46, %v113_v46  ;;  %v1692_v49 = vld [vmem:[#allocation5 + $0x188] ss:$16 sps:$4 sm:$0xff]   ;;  %v1695_v51 = vld [vmem:[#allocation5 + $0x16c] ss:$16 sps:$4 sm:$0xff]   ;;  %v1699_v54 = vld [vmem:[#allocation5 + $0x144] ss:$16 sps:$4 sm:$0xff]  }
  0x60   :  { %531 = vmatpush1.bf16.msra.mxu0 %v1649_v18  ;;  %572 = vmatpush1.bf16.msra.mxu1 %v1650_v19  ;;  %v1698_v53 = vld [vmem:[#allocation5 + $0x168] ss:$16 sps:$4 sm:$0xff]   ;;  %v1701_v55 = vld [vmem:[#allocation5 + $0x14c] ss:$16 sps:$4 sm:$0xff]   ;;  %v1703_v56 = vld [vmem:[#allocation5 + $0x140] ss:$16 sps:$4 sm:$0xff]  }
  0x61   :  { %532 = vmatprep.subr.bf16.mxu0 %v1651_v20  ;;  %573 = vmatprep.subr.bf16.mxu1 %v1653_v21  ;;  %v1704_v57 = vld [vmem:[#allocation5 + $0x148] ss:$16 sps:$4 sm:$0xff]   ;;  %v1705_v58 = vld [vmem:[#allocation5 + $0x124] ss:$16 sps:$4 sm:$0xff]   ;;  %v1707_v59 = vld [vmem:[#allocation5 + $0x12c] ss:$16 sps:$4 sm:$0xff]  }
  0x62   :  { %554 = vmatprep.mubr.bf16.mxu0 %v115_v47  ;;  %595 = vmatprep.mubr.bf16.mxu1 %v115_v47  ;;  %v1709_v60 = vld [vmem:[#allocation5 + $0x120] ss:$16 sps:$4 sm:$0xff]   ;;  %v1710_v61 = vld [vmem:[#allocation5 + $0x128] ss:$16 sps:$4 sm:$0xff]   ;;  %v1711_v62 = vld [vmem:[#allocation5 + $0x104] ss:$16 sps:$4 sm:$0xff]  }
  0x63   :  { %v1713_v63 = vld [vmem:[#allocation5 + $0x10c] ss:$16 sps:$4 sm:$0xff]   ;;  %v1715_v0 = vld [vmem:[#allocation5 + $0x100] ss:$16 sps:$4 sm:$0xff]   ;;  %v1716_v1 = vld [vmem:[#allocation5 + $0x108] ss:$16 sps:$4 sm:$0xff]  }
  0x64   :  { %533 = vmatpush1.bf16.msra.mxu0 %v1655_v22  ;;  %574 = vmatpush1.bf16.msra.mxu1 %v1656_v23  ;;  %v112_v2 = vld [vmem:[#allocation2] sm:$0xff]  ;;  %v1719_v3 = vld [vmem:[#allocation8 + $0x74] ss:$8 sps:$4 sm:$0xff]   ;;  %v1723_v10 = vld [vmem:[#allocation8 + $0x60] ss:$8 sps:$4 sm:$0xff]   ;;  %s2001_s23 = smov [#allocation13]  }
  0x65   :  { %534 = vmatprep.subr.bf16.mxu0 %v1657_v24  ;;  %575 = vmatprep.subr.bf16.mxu1 %v1659_v25  ;;  %v1722_v4 = vld [vmem:[#allocation8 + $0x174] ss:$8 sps:$4 sm:$0xff]   ;;  %v114_v5 = vpack.c.bf16 %v112_v2, %v112_v2  ;;  %v1717_v6 = vld [vmem:[#allocation8 + $0x70] ss:$8 sps:$4 sm:$0xff]   ;;  %v1725_v8 = vld [vmem:[#allocation8 + $0x64] ss:$8 sps:$4 sm:$0xff]  }
  0x66   :  { %v1720_v7 = vld [vmem:[#allocation8 + $0x170] ss:$8 sps:$4 sm:$0xff]   ;;  %v1728_v9 = vld [vmem:[#allocation8 + $0x164] ss:$8 sps:$4 sm:$0xff]   ;;  %v1726_v11 = vld [vmem:[#allocation8 + $0x160] ss:$8 sps:$4 sm:$0xff]  }
  0x67   :  { %v1731_v12 = vld [vmem:[#allocation8 + $0x54] ss:$8 sps:$4 sm:$0xff]   ;;  %v1729_v14 = vld [vmem:[#allocation8 + $0x50] ss:$8 sps:$4 sm:$0xff]   ;;  %v1737_v16 = vld [vmem:[#allocation8 + $0x44] ss:$8 sps:$4 sm:$0xff]  }
  0x68   :  { %535 = vmatpush1.bf16.msra.mxu0 %v1661_v26  ;;  %576 = vmatpush1.bf16.msra.mxu1 %v1662_v27  ;;  %v1734_v13 = vld [vmem:[#allocation8 + $0x154] ss:$8 sps:$4 sm:$0xff]   ;;  %v1732_v15 = vld [vmem:[#allocation8 + $0x150] ss:$8 sps:$4 sm:$0xff]   ;;  %v1740_v17 = vld [vmem:[#allocation8 + $0x144] ss:$8 sps:$4 sm:$0xff]  }
  0x69   :  { %536 = vmatprep.subr.bf16.mxu0 %v1663_v28  ;;  %577 = vmatprep.subr.bf16.mxu1 %v1665_v29  ;;  %v1735_v18 = vld [vmem:[#allocation8 + $0x40] ss:$8 sps:$4 sm:$0xff]   ;;  %v1743_v20 = vld [vmem:[#allocation8 + $0x34] ss:$8 sps:$4 sm:$0xff]   ;;  %v1741_v22 = vld [vmem:[#allocation8 + $0x30] ss:$8 sps:$4 sm:$0xff]  }
  0x6a   :  { %v1738_v19 = vld [vmem:[#allocation8 + $0x140] ss:$8 sps:$4 sm:$0xff]   ;;  %v1746_v21 = vld [vmem:[#allocation8 + $0x134] ss:$8 sps:$4 sm:$0xff]   ;;  %v1744_v23 = vld [vmem:[#allocation8 + $0x130] ss:$8 sps:$4 sm:$0xff]  }
  0x6b   :  { %v1749_v24 = vld [vmem:[#allocation8 + $0x24] ss:$8 sps:$4 sm:$0xff]   ;;  %v1747_v26 = vld [vmem:[#allocation8 + $0x20] ss:$8 sps:$4 sm:$0xff]   ;;  %v1755_v28 = vld [vmem:[#allocation8 + $0x14] ss:$8 sps:$4 sm:$0xff]  }
  0x6c   :  { %537 = vmatpush1.bf16.msra.mxu0 %v1667_v30  ;;  %578 = vmatpush1.bf16.msra.mxu1 %v1668_v31  ;;  %v1752_v25 = vld [vmem:[#allocation8 + $0x124] ss:$8 sps:$4 sm:$0xff]   ;;  %v1750_v27 = vld [vmem:[#allocation8 + $0x120] ss:$8 sps:$4 sm:$0xff]   ;;  %v1758_v29 = vld [vmem:[#allocation8 + $0x114] ss:$8 sps:$4 sm:$0xff]  }
  0x6d   :  { %538 = vmatprep.subr.bf16.mxu0 %v1669_v32  ;;  %579 = vmatprep.subr.bf16.mxu1 %v1671_v33  ;;  %v1753_v30 = vld [vmem:[#allocation8 + $0x10] ss:$8 sps:$4 sm:$0xff]   ;;  %v1761_v32 = vld [vmem:[#allocation8 + $0x4] ss:$8 sps:$4 sm:$0xff]   ;;  %v1807_v2 = vld [vmem:[#allocation8 + $0x80] ss:$8 sps:$4 sm:$0xff]  }
  0x6e   :  { %v1756_v31 = vld [vmem:[#allocation8 + $0x110] ss:$8 sps:$4 sm:$0xff]   ;;  %v1764_v33 = vld [vmem:[#allocation8 + $0x104] ss:$8 sps:$4 sm:$0xff]   ;;  %s1389_s24 = sshll.u32 %s2001_s23, 4  ;;  %s1390_s24 = int_to_ptr.vmem [resolvable:$true] %s1389_s24 }
  0x6f   :  { %v1777_v46 = vld [vmem:[#allocation8 + $0xd0] ss:$8 sps:$4 sm:$0xff]   ;;  %p1962_p3 = scmp.lt.s32.totalorder %s1390_s24, %s1390_s24 }
  0x70   :  { %539 = vmatpush2.bf16.msra.mxu0 %v1673_v34  ;;  %580 = vmatpush2.bf16.msra.mxu1 %v1674_v35  ;;  %v1759_v34 = vld [vmem:[#allocation8] ss:$8 sps:$4 sm:$0xff]   ;;  %v1780_v47 = vld [vmem:[#allocation8 + $0x1d0] ss:$8 sps:$4 sm:$0xff]  }
  0x71   :  { %540 = vmatprep.subr.bf16.mxu0 %v1675_v36  ;;  %581 = vmatprep.subr.bf16.mxu1 %v1677_v37  ;;  %v1762_v35 = vld [vmem:[#allocation8 + $0x100] ss:$8 sps:$4 sm:$0xff]   ;;  %v1767_v36 = vld [vmem:[#allocation8 + $0xf4] ss:$8 sps:$4 sm:$0xff]  }
  0x72   :  { %v1770_v37 = vld [vmem:[#allocation8 + $0x1f4] ss:$8 sps:$4 sm:$0xff]  }
  0x74   :  { %541 = vmatpush2.bf16.msra.mxu0 %v1679_v38  ;;  %582 = vmatpush2.bf16.msra.mxu1 %v1680_v39  ;;  %v1765_v38 = vld [vmem:[#allocation8 + $0xf0] ss:$8 sps:$4 sm:$0xff]  }
  0x75   :  { %542 = vmatprep.subr.bf16.mxu0 %v1681_v40  ;;  %583 = vmatprep.subr.bf16.mxu1 %v1683_v41  ;;  %v1768_v39 = vld [vmem:[#allocation8 + $0x1f0] ss:$8 sps:$4 sm:$0xff]   ;;  %v1773_v40 = vld [vmem:[#allocation8 + $0xe4] ss:$8 sps:$4 sm:$0xff]  }
  0x76   :  { %v1776_v41 = vld [vmem:[#allocation8 + $0x1e4] ss:$8 sps:$4 sm:$0xff]  }
  0x78   :  { %543 = vmatpush2.bf16.msra.mxu0 %v1685_v42  ;;  %584 = vmatpush2.bf16.msra.mxu1 %v1686_v43  ;;  %v1771_v42 = vld [vmem:[#allocation8 + $0xe0] ss:$8 sps:$4 sm:$0xff]  }
  0x79   :  { %544 = vmatprep.subr.bf16.mxu0 %v1687_v44  ;;  %585 = vmatprep.subr.bf16.mxu1 %v1689_v45  ;;  %v1774_v43 = vld [vmem:[#allocation8 + $0x1e0] ss:$8 sps:$4 sm:$0xff]   ;;  %v1779_v44 = vld [vmem:[#allocation8 + $0xd4] ss:$8 sps:$4 sm:$0xff]  }
  0x7a   :  { %v1782_v45 = vld [vmem:[#allocation8 + $0x1d4] ss:$8 sps:$4 sm:$0xff]  }
  0x7c   :  { %545 = vmatpush2.bf16.msra.mxu0 %v1691_v48  ;;  %586 = vmatpush2.bf16.msra.mxu1 %v1692_v49  ;;  %v1785_v48 = vld [vmem:[#allocation8 + $0xc4] ss:$8 sps:$4 sm:$0xff]  }
  0x7d   :  { %546 = vmatprep.subr.bf16.mxu0 %v1693_v50  ;;  %587 = vmatprep.subr.bf16.mxu1 %v1695_v51  ;;  %v1788_v49 = vld [vmem:[#allocation8 + $0x1c4] ss:$8 sps:$4 sm:$0xff]   ;;  %v1783_v50 = vld [vmem:[#allocation8 + $0xc0] ss:$8 sps:$4 sm:$0xff]  }
  0x7e   :  { %v1786_v51 = vld [vmem:[#allocation8 + $0x1c0] ss:$8 sps:$4 sm:$0xff]  }
  0x80   :  { %547 = vmatpush2.bf16.msra.mxu0 %v1697_v52  ;;  %588 = vmatpush2.bf16.msra.mxu1 %v1698_v53  ;;  %v1791_v52 = vld [vmem:[#allocation8 + $0xb4] ss:$8 sps:$4 sm:$0xff]  }
  0x81   :  { %548 = vmatprep.subr.bf16.mxu0 %v1699_v54  ;;  %589 = vmatprep.subr.bf16.mxu1 %v1701_v55  ;;  %v1794_v53 = vld [vmem:[#allocation8 + $0x1b4] ss:$8 sps:$4 sm:$0xff]   ;;  %v1789_v54 = vld [vmem:[#allocation8 + $0xb0] ss:$8 sps:$4 sm:$0xff]  }
  0x82   :  { %v1792_v55 = vld [vmem:[#allocation8 + $0x1b0] ss:$8 sps:$4 sm:$0xff]  }
  0x84   :  { %549 = vmatpush2.bf16.msra.mxu0 %v1703_v56  ;;  %590 = vmatpush2.bf16.msra.mxu1 %v1704_v57  ;;  %v1797_v56 = vld [vmem:[#allocation8 + $0xa4] ss:$8 sps:$4 sm:$0xff]  }
  0x85   :  { %550 = vmatprep.subr.bf16.mxu0 %v1705_v58  ;;  %591 = vmatprep.subr.bf16.mxu1 %v1707_v59  ;;  %v1800_v57 = vld [vmem:[#allocation8 + $0x1a4] ss:$8 sps:$4 sm:$0xff]   ;;  %v1795_v58 = vld [vmem:[#allocation8 + $0xa0] ss:$8 sps:$4 sm:$0xff]  }
  0x86   :  { %v1798_v59 = vld [vmem:[#allocation8 + $0x1a0] ss:$8 sps:$4 sm:$0xff]  }
  0x88   :  { %551 = vmatpush2.bf16.msra.mxu0 %v1709_v60  ;;  %592 = vmatpush2.bf16.msra.mxu1 %v1710_v61  ;;  %v1803_v60 = vld [vmem:[#allocation8 + $0x94] ss:$8 sps:$4 sm:$0xff]  }
  0x89   :  { %552 = vmatprep.subr.bf16.mxu0 %v1711_v62  ;;  %593 = vmatprep.subr.bf16.mxu1 %v1713_v63  ;;  %v1806_v61 = vld [vmem:[#allocation8 + $0x194] ss:$8 sps:$4 sm:$0xff]   ;;  %v1801_v62 = vld [vmem:[#allocation8 + $0x90] ss:$8 sps:$4 sm:$0xff]  }
  0x8a   :  { %v1804_v63 = vld [vmem:[#allocation8 + $0x190] ss:$8 sps:$4 sm:$0xff]  }
  0x8c   :  { %553 = vmatpush2.bf16.msra.mxu0 %v1715_v0  ;;  %594 = vmatpush2.bf16.msra.mxu1 %v1716_v1  ;;  %v1809_v0 = vld [vmem:[#allocation8 + $0x84] ss:$8 sps:$4 sm:$0xff]  }
  0x8d   :  { %1008 = vmatprep.subr.bf16.mxu0 %v1719_v3  ;;  %1049 = vmatprep.subr.bf16.mxu1 %v1722_v4  ;;  %v1812_v1 = vld [vmem:[#allocation8 + $0x184] ss:$8 sps:$4 sm:$0xff]   ;;  %v1810_v3 = vld [vmem:[#allocation8 + $0x180] ss:$8 sps:$4 sm:$0xff]   ;;  %v1813_v4 = vld [vmem:[#allocation10 + $0x78] sm:$0xff]  }
  0x8f   :  { %555 = vmatmul.mubr.bf16.vlgmr.msra.gmra.mxu0 %v114_v5  ;;  %596 = vmatmul.mubr.bf16.vlgmr.msra.gmra.mxu1 %v114_v5  ;;  %v182_v5 = vlaneseq }
  0x90   :  { %1009 = vmatpush1.bf16.msra.mxu0 %v1717_v6  ;;  %1050 = vmatpush1.bf16.msra.mxu1 %v1720_v7 }
  0x91   :  { %1010 = vmatprep.subr.bf16.mxu0 %v1725_v8  ;;  %1051 = vmatprep.subr.bf16.mxu1 %v1728_v9  ;;  %v2070_v6 = vshrl.u32 %v182_v5, 7  ;;  %v180_v9 = vld [vmem:[#allocation7] sm:$0xf] }
  0x93   :  { %v184_v7 = vsub.s32 0, %v2070_v6  ;;  %v192_v8 = vsub.s32 2, %v2070_v6 }
  0x94   :  { %1011 = vmatpush1.bf16.msra.mxu0 %v1723_v10  ;;  %1052 = vmatpush1.bf16.msra.mxu1 %v1726_v11  ;;  %v188_v10 = vsub.s32 1, %v2070_v6  ;;  %v196_v11 = vsub.s32 3, %v2070_v6  ;;  %v1834_v6 = vld [vmem:[#allocation11 + $0x10] sm:$0xff]  }
  0x95   :  { %1012 = vmatprep.subr.bf16.mxu0 %v1731_v12  ;;  %1053 = vmatprep.subr.bf16.mxu1 %v1734_v13  ;;  %v185_v12 = vrot.slane %v180_v9, %v184_v7  ;;  %v193_v13 = vrot.slane %v180_v9, %v192_v8 }
  0x98   :  { %1013 = vmatpush1.bf16.msra.mxu0 %v1729_v14  ;;  %1054 = vmatpush1.bf16.msra.mxu1 %v1732_v15  ;;  %v189_v14 = vrot.slane %v180_v9, %v188_v10  ;;  %v197_v15 = vrot.slane %v180_v9, %v196_v11 }
  0x99   :  { %1014 = vmatprep.subr.bf16.mxu0 %v1737_v16  ;;  %1055 = vmatprep.subr.bf16.mxu1 %v1740_v17 }
  0x9c   :  { %1015 = vmatpush1.bf16.msra.mxu0 %v1735_v18  ;;  %1056 = vmatpush1.bf16.msra.mxu1 %v1738_v19 }
  0x9d   :  { %1016 = vmatprep.subr.bf16.mxu0 %v1743_v20  ;;  %1057 = vmatprep.subr.bf16.mxu1 %v1746_v21 }
  0xa0   :  { %1017 = vmatpush1.bf16.msra.mxu0 %v1741_v22  ;;  %1058 = vmatpush1.bf16.msra.mxu1 %v1744_v23 }
  0xa1   :  { %1018 = vmatprep.subr.bf16.mxu0 %v1749_v24  ;;  %1059 = vmatprep.subr.bf16.mxu1 %v1752_v25 }
  0xa4   :  { %1019 = vmatpush1.bf16.msra.mxu0 %v1747_v26  ;;  %1060 = vmatpush1.bf16.msra.mxu1 %v1750_v27 }
  0xa5   :  { %1020 = vmatprep.subr.bf16.mxu0 %v1755_v28  ;;  %1061 = vmatprep.subr.bf16.mxu1 %v1758_v29 }
  0xa8   :  { %1021 = vmatpush1.bf16.msra.mxu0 %v1753_v30  ;;  %1062 = vmatpush1.bf16.msra.mxu1 %v1756_v31 }
  0xa9   :  { %1022 = vmatprep.subr.bf16.mxu0 %v1761_v32  ;;  %1063 = vmatprep.subr.bf16.mxu1 %v1764_v33 }
  0xac   :  { %1023 = vmatpush1.bf16.msra.mxu0 %v1759_v34  ;;  %1064 = vmatpush1.bf16.msra.mxu1 %v1762_v35  ;;  %v1814_v35 = vld [vmem:[#allocation10 + $0x38] sm:$0xff]  }
  0xad   :  { %1024 = vmatprep.subr.bf16.mxu0 %v1767_v36  ;;  %1065 = vmatprep.subr.bf16.mxu1 %v1770_v37  ;;  %v1815_v37 = vld [vmem:[#allocation10 + $0x70] sm:$0xff]  }
  0xb0   :  { %1025 = vmatpush2.bf16.msra.mxu0 %v1765_v38  ;;  %1066 = vmatpush2.bf16.msra.mxu1 %v1768_v39  ;;  %v1816_v38 = vld [vmem:[#allocation10 + $0x30] sm:$0xff]   ;;  %v1817_v39 = vld [vmem:[#allocation10 + $0x68] sm:$0xff]  }
  0xb1   :  { %1026 = vmatprep.subr.bf16.mxu0 %v1773_v40  ;;  %1067 = vmatprep.subr.bf16.mxu1 %v1776_v41  ;;  %v1818_v40 = vld [vmem:[#allocation10 + $0x28] sm:$0xff]   ;;  %v1819_v41 = vld [vmem:[#allocation10 + $0x60] sm:$0xff]  }
  0xb4   :  { %1027 = vmatpush2.bf16.msra.mxu0 %v1771_v42  ;;  %1068 = vmatpush2.bf16.msra.mxu1 %v1774_v43  ;;  %v1820_v42 = vld [vmem:[#allocation10 + $0x20] sm:$0xff]   ;;  %v1821_v43 = vld [vmem:[#allocation10 + $0x58] sm:$0xff]  }
  0xb5   :  { %1028 = vmatprep.subr.bf16.mxu0 %v1779_v44  ;;  %1069 = vmatprep.subr.bf16.mxu1 %v1782_v45  ;;  %v1822_v44 = vld [vmem:[#allocation10 + $0x18] sm:$0xff]   ;;  %v1823_v45 = vld [vmem:[#allocation10 + $0x50] sm:$0xff]  }
  0xb8   :  { %1029 = vmatpush2.bf16.msra.mxu0 %v1777_v46  ;;  %1070 = vmatpush2.bf16.msra.mxu1 %v1780_v47  ;;  %v1824_v46 = vld [vmem:[#allocation10 + $0x10] sm:$0xff]   ;;  %v1825_v47 = vld [vmem:[#allocation10 + $0x48] sm:$0xff]  }
  0xb9   :  { %1030 = vmatprep.subr.bf16.mxu0 %v1785_v48  ;;  %1071 = vmatprep.subr.bf16.mxu1 %v1788_v49  ;;  %v1826_v48 = vld [vmem:[#allocation10 + $0x8] sm:$0xff]   ;;  %v1827_v49 = vld [vmem:[#allocation10 + $0x40] sm:$0xff]  }
  0xbc   :  { %1031 = vmatpush2.bf16.msra.mxu0 %v1783_v50  ;;  %1072 = vmatpush2.bf16.msra.mxu1 %v1786_v51  ;;  %v1828_v50 = vld [vmem:[#allocation10] sm:$0xff]   ;;  %v1829_v51 = vld [vmem:[#allocation11 + $0x38] sm:$0xff]  }
  0xbd   :  { %1032 = vmatprep.subr.bf16.mxu0 %v1791_v52  ;;  %1073 = vmatprep.subr.bf16.mxu1 %v1794_v53  ;;  %v1999_v52 = vmov 0.0   ;;  %v1830_v53 = vld [vmem:[#allocation11 + $0x30] sm:$0xff]  }
  0xc0   :  { %1033 = vmatpush2.bf16.msra.mxu0 %v1789_v54  ;;  %1074 = vmatpush2.bf16.msra.mxu1 %v1792_v55  ;;  %v1831_v54 = vld [vmem:[#allocation11 + $0x28] sm:$0xff]   ;;  %v1832_v55 = vld [vmem:[#allocation11 + $0x20] sm:$0xff]  }
  0xc1   :  { %1034 = vmatprep.subr.bf16.mxu0 %v1797_v56  ;;  %1075 = vmatprep.subr.bf16.mxu1 %v1800_v57  ;;  %v1833_v56 = vld [vmem:[#allocation11 + $0x18] sm:$0xff]   ;;  %v676_v57 = vld [vmem:[%s2100_s4] sm:$0x3] }
  0xc4   :  { %1035 = vmatpush2.bf16.msra.mxu0 %v1795_v58  ;;  %1076 = vmatpush2.bf16.msra.mxu1 %v1798_v59  ;;  %v681_v58 = vrot.slane %v676_v57, %v184_v7  ;;  %v685_v59 = vrot.slane %v676_v57, %v188_v10  ;;  %v1835_v7 = vld [vmem:[#allocation11 + $0x8] sm:$0xff]   ;;  %v1836_v10 = vld [vmem:[#allocation11] sm:$0xff]  }
  0xc5   :  { %1036 = vmatprep.subr.bf16.mxu0 %v1803_v60  ;;  %1077 = vmatprep.subr.bf16.mxu1 %v1806_v61 }
  0xc8   :  { %1037 = vmatpush2.bf16.msra.mxu0 %v1801_v62  ;;  %1078 = vmatpush2.bf16.msra.mxu1 %v1804_v63 }
  0xc9   :  { %1038 = vmatprep.subr.bf16.mxu0 %v1809_v0  ;;  %1079 = vmatprep.subr.bf16.mxu1 %v1812_v1 }
  0xcc   :  { %1039 = vmatpush2.bf16.msra.mxu0 %v1807_v2  ;;  %1080 = vmatpush2.bf16.msra.mxu1 %v1810_v3 }
  0xcd   :  { %1555 = vmatprep.subr.bf16.mxu0 %v1813_v4  ;;  %1586 = vmatprep.subr.bf16.mxu1 %v1999_v52 }
 0x14f   :  { %v556_v16 = vpop.f32.mrf.mxu0  ;;  %v597_v17 = vpop.f32.mrf.mxu1 }
 0x150   :  { %v557_v18 = vadd.f32 %v556_v16, %v185_v12  ;;  %v598_v19 = vadd.f32 %v597_v17, %v193_v13  ;;  %v1529_v16 = vld [vmem:[%s2102_s6] ss:$0 sm:$0xff]  ;;  %s1957_s6 = scalar_lea.vmem %s1390_s24, 128 }
 0x151   :  { %v558_v20 = vpop.f32.mrf.mxu0  ;;  %v599_v21 = vpop.f32.mrf.mxu1  ;;  %p1958_p2 = scmp.ne.s32.totalorder %s1390_s24, %s1957_s6  ;;  %p1963_p4 = scmp.lt.s32.totalorder %s1957_s6, %s1957_s6 }
 0x152   :  { %v606_v22 = vmax.f32 %v598_v19, 0.0  ;;  %v559_v23 = vadd.f32 %v558_v20, %v189_v14  ;;  %v600_v24 = vadd.f32 %v599_v21, %v197_v15  ;;  %v604_v25 = vmax.f32 %v557_v18, 0.0 }
 0x153   :  { %v560_v26 = vpop.f32.mrf.mxu0  ;;  %v601_v27 = vpop.f32.mrf.mxu1  ;;  %p1964_p5 = por %p1963_p4, %p1962_p3 }
 0x154   :  { %v605_v28 = vmax.f32 %v559_v23, 0.0  ;;  %v607_v29 = vmax.f32 %v600_v24, 0.0  ;;  %v610_v30 = vpack.c.bf16 %v606_v22, %v606_v22  ;;  %v608_v36 = vpack.c.bf16 %v604_v25, %v604_v25  ;;  %v1546_v24 = vld [vmem:[%s2104_s8] ss:$0 sm:$0xff] }
 0x155   :  { %v561_v31 = vpop.f32.mrf.mxu0  ;;  %v602_v32 = vpop.f32.mrf.mxu1  ;;  %p1965_p6 = pnand %p1964_p5, %p1958_p2 }
 0x156   :  { %v609_v33 = vpack.c.bf16 %v605_v28, %v605_v28  ;;  %v611_v34 = vpack.c.bf16 %v607_v29, %v607_v29 }
 0x158   :  { %1040 = vmatprep.mubr.bf16.mxu0 %v609_v33  ;;  %1081 = vmatprep.mubr.bf16.mxu1 %v611_v34 }
 0x159   :  { %1041 = vmatmul.mubr.bf16.vlgmr.msra.gmra.mxu0 %v608_v36  ;;  %1082 = vmatmul.mubr.bf16.vlgmr.msra.gmra.mxu1 %v610_v30 }
 0x15a   :  { %1556 = vmatpush3.bf16.msra.mxu0 %v1814_v35  ;;  %1587 = vmatpush3.bf16.msra.mxu1 %v1829_v51 }
 0x15b   :  { %1557 = vmatprep.subr.bf16.mxu0 %v1815_v37  ;;  %1588 = vmatprep.subr.bf16.mxu1 %v1999_v52 }
 0x15c   :  { %1602 = vmatprep.mubr.msk.bf16.mxu1 %vm2000_vm0, %v1999_v52 }
 0x15e   :  { %1558 = vmatpush3.bf16.msra.mxu0 %v1816_v38  ;;  %1589 = vmatpush3.bf16.msra.mxu1 %v1830_v53 }
 0x15f   :  { %1559 = vmatprep.subr.bf16.mxu0 %v1817_v39  ;;  %1590 = vmatprep.subr.bf16.mxu1 %v1999_v52 }
 0x162   :  { %1560 = vmatpush3.bf16.msra.mxu0 %v1818_v40  ;;  %1591 = vmatpush3.bf16.msra.mxu1 %v1831_v54 }
 0x163   :  { %1561 = vmatprep.subr.bf16.mxu0 %v1819_v41  ;;  %1592 = vmatprep.subr.bf16.mxu1 %v1999_v52 }
 0x166   :  { %1562 = vmatpush3.bf16.msra.mxu0 %v1820_v42  ;;  %1593 = vmatpush3.bf16.msra.mxu1 %v1832_v55 }
 0x167   :  { %1563 = vmatprep.subr.bf16.mxu0 %v1821_v43  ;;  %1594 = vmatprep.subr.bf16.mxu1 %v1999_v52 }
 0x16a   :  { %1564 = vmatpush3.bf16.msra.mxu0 %v1822_v44  ;;  %1595 = vmatpush3.bf16.msra.mxu1 %v1833_v56 }
 0x16b   :  { %1565 = vmatprep.subr.bf16.mxu0 %v1823_v45  ;;  %1596 = vmatprep.subr.bf16.mxu1 %v1999_v52 }
 0x16e   :  { %1566 = vmatpush3.bf16.msra.mxu0 %v1824_v46  ;;  %1597 = vmatpush3.bf16.msra.mxu1 %v1834_v6 }
 0x16f   :  { %1567 = vmatprep.subr.bf16.mxu0 %v1825_v47  ;;  %1598 = vmatprep.subr.bf16.mxu1 %v1999_v52 }
 0x172   :  { %1568 = vmatpush3.bf16.msra.mxu0 %v1826_v48  ;;  %1599 = vmatpush3.bf16.msra.mxu1 %v1835_v7 }
 0x173   :  { %1569 = vmatprep.subr.bf16.mxu0 %v1827_v49  ;;  %1600 = vmatprep.subr.bf16.mxu1 %v1999_v52 }
 0x176   :  { %1570 = vmatpush3.bf16.msra.mxu0 %v1828_v50  ;;  %1601 = vmatpush3.bf16.msra.mxu1 %v1836_v10 }
 0x219   :  { %v1042_v60 = vpop.f32.mrf.mxu0  ;;  %v1083_v61 = vpop.f32.mrf.mxu1 }
 0x21a   :  { %v1043_v62 = vadd.f32 %v1042_v60, %v681_v58 }
 0x21b   :  { %v1044_v63 = vpop.f32.mrf.mxu0  ;;  %v1085_v0 = vpop.f32.mrf.mxu1 }
 0x21c   :  { %v1084_v1 = vadd.f32 %v1083_v61, %v1043_v62  ;;  %v1045_v2 = vadd.f32 %v1044_v63, %v685_v59 }
 0x21d   :  { %v1046_v3 = vpop.f32.mrf.mxu0  ;;  %v1087_v4 = vpop.f32.mrf.mxu1 }
 0x21e   :  { %v1086_v5 = vadd.f32 %v1085_v0, %v1045_v2  ;;  %v1090_v8 = vmax.f32 %v1084_v1, 0.0 }
 0x21f   :  { %v1047_v9 = vpop.f32.mrf.mxu0  ;;  %v1088_v11 = vpop.f32.mrf.mxu1 }
 0x220   :  { %v1091_v12 = vmax.f32 %v1086_v5, 0.0  ;;  %v1092_v14 = vpack.c.bf16 %v1090_v8, %v1090_v8 }
 0x222   :  { %v1093_v13 = vpack.c.bf16 %v1091_v12, %v1091_v12 }
 0x224   :  { %1261 = vmatprep.mubr.bf16.mxu0 %v1093_v13 }
 0x225   :  { %1262 = vmatmul.mubr.bf16.vlgmr.msra.gmra.mxu0 %v1092_v14 }
 0x2e5   :  { %v1571_v15 = vpop.f32.mrf.mxu0 }
 0x2e7   :  { %v1572_v17 = vpop.f32.mrf.mxu0 }
 0x2e8   :  { %v1573_v18 = vadd.f32 %v1572_v17, %v1571_v15 }
 0x2e9   :  { %v1574_v19 = vpop.f32.mrf.mxu0 }
 0x2ea   :  { %v1264_v20 = vadd.f32 %v1573_v18, %v1529_v16 }
 0x2eb   :  { %v1575_v21 = vpop.f32.mrf.mxu0 }
 0x2ec   :  { %v1269_v22 = vmax.f32 %v1264_v20, 0.0 }
 0x2ee   :  { %v1270_v23 = vpack.c.bf16 %v1269_v22, %v1269_v22 }
 0x2f0   :  { %1603 = vmatmul.mubr.bf16.vlgmr.msra.gmra.mxu1 %v1270_v23 }
 0x3b0   :  { %v1376_v25 = vpop.f32.mrf.mxu1 }
 0x3b1   :  { %v1377_v26 = vadd.f32 %v1546_v24, %v1376_v25 }
 0x3b2   :  { %v1604_v27 = vpop.f32.mrf.mxu1 }
 0x3b3   :  { %1382 = vst [vmem:[#allocation13] sm:$0xff] %v1377_v26 }
 0x3b4   :  { %v1379_v28 = vpop.f32.mrf.mxu1 }
 0x3b5   :  { %1968 = shalt.err (!%p1965_p6)
}
 0x3b6   :  { %1392 = dma.vmem_to_hbm [thread:$0]  %s1390_s24, 128, %s2105_s9, [#allocation4]   ;;  %v1605_v29 = vpop.f32.mrf.mxu1 }
 0x3b7   :  { %1985 = dma.done.wait [#allocation4], 128  }
 0x3b8   :  { %1986 = vsyncadd [#allocation4], 4294967168 }
 0x3b9   :  { %1396 = vsyncpa [#allocation3], 1 }
 0x3ba   :  { %1397 = vsyncpa [#allocation6], 1 }
 0x3bb   :  { %1398 = vsyncpa [#allocation9], 1 }
 0x3bc   :  { %1399 = vsyncpa [#allocation12], 1 }
 0x3bd   :  { %1400 = vsyncpa [#allocation4], 1 }

</bundles_post_ra>
